<compile_context>
chip_gen: v5e
topology: v5e:2x2
jax: 0.10.0
libtpu: 0.0.40
codegen_flags: <defaults>
</compile_context>

<pallas_src>
import jax
import jax.numpy as jnp
from jax.experimental import pallas as pl
from jax.experimental.pallas import tpu as pltpu


def _round_up(x, m):
    return ((x + m - 1) // m) * m


def _pick_tile(total, cap=512):
    """Largest multiple-of-128 tile <= cap that divides `total` (total % 128 == 0)."""
    for t in (512, 384, 256, 128):
        if t <= cap and total % t == 0:
            return t
    return 128


def _matmul_kernel(x_ref, w_ref, z_ref, acc_ref):
    """z[i, j] = sum_k x[i, k] @ w[k, j]; grid = (M, N, K), K is the reduction."""
    @pl.when(pl.program_id(2) == 0)
    def _init():
        acc_ref[...] = jnp.zeros_like(acc_ref)

    acc_ref[...] += jnp.dot(
        x_ref[...], w_ref[...], preferred_element_type=jnp.float32
    )

    @pl.when(pl.program_id(2) == pl.num_programs(2) - 1)
    def _store():
        z_ref[...] = acc_ref[...].astype(z_ref.dtype)


def invertible_1x1_conv_forward(x, P, L, U, S, *, block_batch_max=512):
    """x: (N, dim). Returns (z = x @ W : (N, dim), log_det: scalar f32)."""
    n, dim = x.shape
    dtype = x.dtype

    # ---- one-time weight assembly (hoisted out of the hot Pallas loop) ----
    eye = jnp.eye(dim, dtype=jnp.float32)
    L_mat = jnp.tril(L.astype(jnp.float32), k=-1) + eye
    U_mat = jnp.triu(U.astype(jnp.float32), k=1)
    W = (P.astype(jnp.float32) @ L_mat @ (U_mat + jnp.diag(S.astype(jnp.float32))))
    W = W.astype(dtype)

    # x-independent scalar; no reason to recompute/write it per grid step.
    log_det = jnp.sum(jnp.log(jnp.abs(S))).astype(jnp.float32)

    # ---- pad to lane-dense / tileable shapes ----
    dim_pad = _round_up(max(dim, 128), 128)          # lane axis multiple of 128
    bm = min(block_batch_max, _round_up(n, 8))       # batch tile (multiple of 8)
    n_pad = _round_up(n, bm)
    bk = _pick_tile(dim_pad)
    bn = _pick_tile(dim_pad)

    x_p = jnp.zeros((n_pad, dim_pad), dtype).at[:n, :dim].set(x)
    w_p = jnp.zeros((dim_pad, dim_pad), dtype).at[:dim, :dim].set(W)

    grid = (n_pad // bm, dim_pad // bn, dim_pad // bk)

    # Rough VMEM budget: double-buffered x/W/z tiles + f32 accumulator.
    tile_bytes = 4 * (2 * (bm * bk + bk * bn + bm * bn) + bm * bn)
    vmem_limit = max(2 * tile_bytes, 32 * 1024 * 1024)

    z_p = pl.pallas_call(
        _matmul_kernel,
        out_shape=jax.ShapeDtypeStruct((n_pad, dim_pad), dtype),
        grid_spec=pltpu.PrefetchScalarGridSpec(
            num_scalar_prefetch=0,
            grid=grid,
            in_specs=[
                pl.BlockSpec((bm, bk), lambda i, j, k: (i, k)),  # x tile
                pl.BlockSpec((bk, bn), lambda i, j, k: (k, j)),  # W tile
            ],
            out_specs=pl.BlockSpec((bm, bn), lambda i, j, k: (i, j)),
            scratch_shapes=[pltpu.VMEM((bm, bn), jnp.float32)],
        ),
        compiler_params=pltpu.CompilerParams(
            dimension_semantics=("parallel", "parallel", "arbitrary"),
            vmem_limit_bytes=vmem_limit,
        ),
    )(x_p, w_p)

    return z_p[:n, :dim], log_det


def _reference_forward(x, P, L, U, S):
    dim = x.shape[1]
    L_ref = jnp.tril(L, k=-1) + jnp.eye(dim, dtype=jnp.float32)
    U_ref = jnp.triu(U, k=1)
    W_ref = P @ L_ref @ (U_ref + jnp.diag(S))
    return x @ W_ref, jnp.sum(jnp.log(jnp.abs(S)))


def init_params(key, dim):
    """Deterministic parameter init mirroring the PyTorch __init__."""
    Q = jax.random.orthogonal(key, dim).astype(jnp.float32)
    P, L, U = jax.scipy.linalg.lu(Q)           # Q = P @ L @ U
    S = jnp.diag(U)
    U_param = jnp.triu(U, k=1)
    return (P.astype(jnp.float32), L.astype(jnp.float32),
            U_param.astype(jnp.float32), S.astype(jnp.float32))


if __name__ == "__main__":
    key = jax.random.PRNGKey(0)
    k_param, k_x, k2 = jax.random.split(key, 3)

    # --- primary test: shapes matching the module's typical (tabular) use ---
    dim, batch = 4, 16
    P, L, U, S = init_params(k_param, dim)
    x = jax.random.normal(k_x, (batch, dim), dtype=jnp.float32)

    z, log_det = invertible_1x1_conv_forward(x, P, L, U, S)
    jax.block_until_ready((z, log_det))

    z_ref, log_det_ref = _reference_forward(x, P, L, U, S)
    assert jnp.allclose(z, z_ref, atol=1e-5, rtol=1e-5)
    assert jnp.allclose(log_det, log_det_ref, atol=1e-6, rtol=1e-6)

    # --- secondary test: ragged batch + non-128-multiple dim (exercise padding/tiling) ---
    ka, kb, kc, kd, ke = jax.random.split(k2, 5)
    dim2, batch2 = 160, 200
    P2 = jax.random.normal(ka, (dim2, dim2), dtype=jnp.float32)
    L2 = jax.random.normal(kb, (dim2, dim2), dtype=jnp.float32)
    U2 = jax.random.normal(kc, (dim2, dim2), dtype=jnp.float32)
    S2 = jax.random.uniform(kd, (dim2,), minval=0.5, maxval=1.5, dtype=jnp.float32)
    x2 = jax.random.normal(ke, (batch2, dim2), dtype=jnp.float32)

    z2, log_det2 = invertible_1x1_conv_forward(x2, P2, L2, U2, S2)
    jax.block_until_ready((z2, log_det2))

    z2_ref, log_det2_ref = _reference_forward(x2, P2, L2, U2, S2)
    assert jnp.allclose(z2, z2_ref, atol=1e-3, rtol=1e-3)
    assert jnp.allclose(log_det2, log_det2_ref, atol=1e-5, rtol=1e-5)

    print("KERNEL_OK")
</pallas_src>

<mosaic_0001>
module attributes {stable_mosaic.version = 11 : i64} {
  func.func @_matmul_kernel(%arg0: i32, %arg1: i32, %arg2: i32, %arg3: memref<16x128xf32, #tpu.memory_space<vmem>>, %arg4: memref<128x128xf32, #tpu.memory_space<vmem>>, %arg5: memref<16x128xf32, #tpu.memory_space<vmem>>, %arg6: memref<16x128xf32, #tpu.memory_space<vmem>>) attributes {dimension_semantics = [#tpu.dimension_semantics<parallel>, #tpu.dimension_semantics<parallel>, #tpu.dimension_semantics<arbitrary>], iteration_bounds = array<i64: 1, 1, 1>, scalar_prefetch = 0 : i64, scratch_operands = 1 : i64, tpu.core_type = #tpu.core_type<tc>, window_params = [{transform_indices = @transform_0, window_bounds = array<i64: 16, 128>}, {transform_indices = @transform_1, window_bounds = array<i64: 128, 128>}, {transform_indices = @transform_2, window_bounds = array<i64: 16, 128>}]} {
    %c0_i32 = arith.constant 0 : i32
    %0 = arith.cmpi eq, %arg2, %c0_i32 : i32
    %1 = arith.extui %0 : i1 to i32
    %c0_i32_0 = arith.constant 0 : i32
    %2 = arith.cmpi ne, %1, %c0_i32_0 : i32
    scf.if %2 {
      %cst_10 = arith.constant 0.000000e+00 : f32
      %12 = vector.broadcast %cst_10 : f32 to vector<16x128xf32>
      %c0_11 = arith.constant 0 : index
      %c0_12 = arith.constant 0 : index
      %13 = vector.load %arg6[%c0_11, %c0_12] : memref<16x128xf32, #tpu.memory_space<vmem>>, vector<16x128xf32>
      tpu.vector_store %arg6[%c0_11, %c0_12], %12 {strides = array<i32>} : memref<16x128xf32, #tpu.memory_space<vmem>>, vector<16x128xf32>,
    } else {
    }
    %c0 = arith.constant 0 : index
    %c0_1 = arith.constant 0 : index
    %3 = vector.load %arg6[%c0, %c0_1] : memref<16x128xf32, #tpu.memory_space<vmem>>, vector<16x128xf32>
    %c0_2 = arith.constant 0 : index
    %c0_3 = arith.constant 0 : index
    %4 = vector.load %arg3[%c0_2, %c0_3] : memref<16x128xf32, #tpu.memory_space<vmem>>, vector<16x128xf32>
    %c0_4 = arith.constant 0 : index
    %c0_5 = arith.constant 0 : index
    %5 = vector.load %arg4[%c0_4, %c0_5] : memref<128x128xf32, #tpu.memory_space<vmem>>, vector<128x128xf32>
    %cst = arith.constant dense<0.000000e+00> : vector<16x128xf32>
    %6 = tpu.matmul %4, %5, %cst {dimension_numbers = #tpu.dot_dimension_numbers<[1], [0], [0], [1], [0, 0, 1, 1], [], []>} : vector<16x128xf32>, vector<128x128xf32>, vector<16x128xf32> -> vector<16x128xf32>
    %7 = arith.addf %3, %6 : vector<16x128xf32>
    %c0_6 = arith.constant 0 : index
    %c0_7 = arith.constant 0 : index
    %8 = vector.load %arg6[%c0_6, %c0_7] : memref<16x128xf32, #tpu.memory_space<vmem>>, vector<16x128xf32>
    tpu.vector_store %arg6[%c0_6, %c0_7], %7 {strides = array<i32>} : memref<16x128xf32, #tpu.memory_space<vmem>>, vector<16x128xf32>,
    %c0_i32_8 = arith.constant 0 : i32
    %9 = arith.cmpi eq, %arg2, %c0_i32_8 : i32
    %10 = arith.extui %9 : i1 to i32
    %c0_i32_9 = arith.constant 0 : i32
    %11 = arith.cmpi ne, %10, %c0_i32_9 : i32
    scf.if %11 {
      %c0_10 = arith.constant 0 : index
      %c0_11 = arith.constant 0 : index
      %12 = vector.load %arg6[%c0_10, %c0_11] : memref<16x128xf32, #tpu.memory_space<vmem>>, vector<16x128xf32>
      %c0_12 = arith.constant 0 : index
      %c0_13 = arith.constant 0 : index
      %13 = vector.load %arg5[%c0_12, %c0_13] : memref<16x128xf32, #tpu.memory_space<vmem>>, vector<16x128xf32>
      tpu.vector_store %arg5[%c0_12, %c0_13], %12 {strides = array<i32>} : memref<16x128xf32, #tpu.memory_space<vmem>>, vector<16x128xf32>,
    } else {
    }
    return
  }
  func.func @transform_0(%arg0: i32, %arg1: i32, %arg2: i32) -> (i32, i32) {
    %c0_i32 = arith.constant 0 : i32
    return %arg0, %arg2 : i32, i32
  }
  func.func @transform_1(%arg0: i32, %arg1: i32, %arg2: i32) -> (i32, i32) {
    %c0_i32 = arith.constant 0 : i32
    return %arg2, %arg1 : i32, i32
  }
  func.func @transform_2(%arg0: i32, %arg1: i32, %arg2: i32) -> (i32, i32) {
    %c0_i32 = arith.constant 0 : i32
    return %arg0, %arg1 : i32, i32
  }
}

</mosaic_0001>

<bundles_post_ra>
// kernel: tpu_custom_call.1
= control target key start
LH: loop header
LB: loop body
LE: loop exit
PB: predicated region body
PF: predicated region fallthrough
CT: control target
= control target key end

     0   :  { %7 = vsyncpa [#allocation4], 0  ;;  %s261_s0 = inlined_call_operand.hbm [shape: f32[16,128], index: 0, kind: input, shape index: {}]   ;;  %s262_s1 = inlined_call_operand.hbm [shape: f32[128,128], index: 1, kind: input, shape index: {}]   ;;  %s263_s2 = inlined_call_operand.hbm [shape: f32[16,128], index: 2, kind: output, shape index: {}]  }
   0x1   :  { %8 = vsyncpa [#allocation7], 0 }
   0x2   :  { %9 = vsyncpa [#allocation5], 0  ;;  %s14_s11 = sshll.u32 %s261_s0, 4  ;;  %s223_s12 = smov [#allocation3]   ;;  %s15_s11 = int_to_ptr.hbm [resolvable:$true] %s14_s11 }
   0x3   :  { %s16_s13 = sshll.u32 %s223_s12, 4  ;;  %s27_s16 = sshll.u32 %s262_s1, 4  ;;  %s17_s13 = int_to_ptr.vmem [resolvable:$true] %s16_s13  ;;  %s28_s16 = int_to_ptr.hbm [resolvable:$true] %s27_s16 }
   0x4   :  { %s224_s17 = smov 128   ;;  %s225_s18 = smov 8  }
   0x5   :  { %22 = dma.hbm_to_vmem [thread:$0]  %s15_s11, 256, %s17_s13, [#allocation4], %s224_s17, %s224_s17, %s225_s18  }
   0x6   :  { %s226_s19 = smov [#allocation6]  }
   0x7   :  { %s29_s20 = sshll.u32 %s226_s19, 4  ;;  %s30_s20 = int_to_ptr.vmem [resolvable:$true] %s29_s20 }
   0x8   :  { %35 = dma.hbm_to_vmem [thread:$0]  %s28_s16, 2048, %s30_s20, [#allocation7], %s224_s17, %s224_s17, %s225_s18  }
   0x9   :  { %217 = dma.done.wait [#allocation4], 256  }
   0xa   :  { %218 = vsyncadd [#allocation4], 4294967040 }
   0xb   :  { %219 = dma.done.wait [#allocation7], 2048  }
   0xc   :  { %220 = vsyncadd [#allocation7], 4294965248  ;;  %v69_v0 = vld [vmem:[#allocation6 + $0x78] sm:$0xff]  ;;  %v68_v1 = vld [vmem:[#allocation6 + $0x70] sm:$0xff]  ;;  %s227_s0 = smov [#allocation8]   ;;  %s110_s23 = sshll.u32 %s263_s2, 4  ;;  %s111_s23 = int_to_ptr.hbm [resolvable:$true] %s110_s23 }
   0xd   :  { %70 = vmatpush.msra.mxu0 %v69_v0  ;;  %124 = vmatpush.msra.mxu1 %v69_v0  ;;  %v67_v2 = vld [vmem:[#allocation6 + $0x68] sm:$0xff]  ;;  %v66_v3 = vld [vmem:[#allocation6 + $0x60] sm:$0xff]  ;;  %v65_v4 = vld [vmem:[#allocation6 + $0x58] sm:$0xff]  ;;  %s108_s1 = sshll.u32 %s227_s0, 4  ;;  %s109_s1 = int_to_ptr.vmem [resolvable:$true] %s108_s1 }
   0xe   :  { %v64_v5 = vld [vmem:[#allocation6 + $0x50] sm:$0xff]  ;;  %v63_v6 = vld [vmem:[#allocation6 + $0x48] sm:$0xff]  ;;  %v62_v7 = vld [vmem:[#allocation6 + $0x40] sm:$0xff] }
   0xf   :  { %71 = vmatpush.msra.mxu0 %v68_v1  ;;  %125 = vmatpush.msra.mxu1 %v68_v1  ;;  %v61_v8 = vld [vmem:[#allocation6 + $0x38] sm:$0xff]  ;;  %v60_v9 = vld [vmem:[#allocation6 + $0x30] sm:$0xff]  ;;  %v59_v10 = vld [vmem:[#allocation6 + $0x28] sm:$0xff] }
  0x10   :  { %v58_v11 = vld [vmem:[#allocation6 + $0x20] sm:$0xff]  ;;  %v57_v12 = vld [vmem:[#allocation6 + $0x18] sm:$0xff]  ;;  %v56_v13 = vld [vmem:[#allocation6 + $0x10] sm:$0xff] }
  0x11   :  { %72 = vmatpush.msra.mxu0 %v67_v2  ;;  %126 = vmatpush.msra.mxu1 %v67_v2  ;;  %v55_v14 = vld [vmem:[#allocation6 + $0x8] sm:$0xff]  ;;  %v54_v15 = vld [vmem:[#allocation6] sm:$0xff]  ;;  %v52_v16 = vld [vmem:[#allocation3] sm:$0xff] }
  0x12   :  { %v53_v17 = vld [vmem:[#allocation3 + $0x8] sm:$0xff] }
  0x13   :  { %73 = vmatpush.msra.mxu0 %v66_v3  ;;  %127 = vmatpush.msra.mxu1 %v66_v3 }
  0x15   :  { %74 = vmatpush.msra.mxu0 %v65_v4  ;;  %128 = vmatpush.msra.mxu1 %v65_v4 }
  0x17   :  { %75 = vmatpush.msra.mxu0 %v64_v5  ;;  %129 = vmatpush.msra.mxu1 %v64_v5 }
  0x19   :  { %76 = vmatpush.msra.mxu0 %v63_v6  ;;  %130 = vmatpush.msra.mxu1 %v63_v6 }
  0x1b   :  { %77 = vmatpush.msra.mxu0 %v62_v7  ;;  %131 = vmatpush.msra.mxu1 %v62_v7 }
  0x1d   :  { %78 = vmatpush.msra.mxu0 %v61_v8  ;;  %132 = vmatpush.msra.mxu1 %v61_v8 }
  0x1f   :  { %79 = vmatpush.msra.mxu0 %v60_v9  ;;  %133 = vmatpush.msra.mxu1 %v60_v9 }
  0x21   :  { %80 = vmatpush.msra.mxu0 %v59_v10  ;;  %134 = vmatpush.msra.mxu1 %v59_v10 }
  0x23   :  { %81 = vmatpush.msra.mxu0 %v58_v11  ;;  %135 = vmatpush.msra.mxu1 %v58_v11 }
  0x25   :  { %82 = vmatpush.msra.mxu0 %v57_v12  ;;  %136 = vmatpush.msra.mxu1 %v57_v12 }
  0x27   :  { %83 = vmatpush.msra.mxu0 %v56_v13  ;;  %137 = vmatpush.msra.mxu1 %v56_v13 }
  0x29   :  { %84 = vmatpush.msra.mxu0 %v55_v14  ;;  %138 = vmatpush.msra.mxu1 %v55_v14 }
  0x2b   :  { %85 = vmatpush.msra.mxu0 %v54_v15  ;;  %139 = vmatpush.msra.mxu1 %v54_v15 }
  0x2c   :  { %86 = vmatmul.f32.vlgmr.msra.gmra.mxu0 %v52_v16  ;;  %89 = vmatmul.f32.vlgmr.msra.gmra.mxu1 %v53_v17 }
  0xa9   :  { %v87_v18 = vpop.f32.mrf.mxu0  ;;  %v90_v19 = vpop.f32.mrf.mxu1 }
  0xaa   :  { %102 = vst [vmem:[#allocation8] sm:$0xff] %v87_v18 }
  0xab   :  { %103 = vst [vmem:[#allocation8 + $0x8] sm:$0xff] %v90_v19 }
  0xac   :  { %116 = dma.vmem_to_hbm [thread:$0]  %s109_s1, 256, %s111_s23, [#allocation5], %s224_s17, %s224_s17, %s225_s18  }
  0xad   :  { %221 = dma.done.wait [#allocation5], 256  }
  0xae   :  { %222 = vsyncadd [#allocation5], 4294967040 }
  0xaf   :  { %121 = vsyncpa [#allocation4], 1 }
  0xb0   :  { %122 = vsyncpa [#allocation7], 1 }
  0xb1   :  { %123 = vsyncpa [#allocation5], 1 }

</bundles_post_ra>
